<compile_context>
chip_gen: v6e
topology: v6e:2x2x1
jax: 0.10.0
libtpu: 0.0.40
codegen_flags: <defaults>
</compile_context>

<pallas_src>
import numpy as np
import jax
import jax.numpy as jnp
from jax.experimental import pallas as pl
from jax.experimental.pallas import tpu as pltpu


def _axis_interp_matrix(in_size: int, target_size: int, pad_before: int) -> np.ndarray:
    """(target_size, in_size) matrix M with M @ v == pad(upsample2x_align_corners(v)).

    `pad_before` is the leading pad from F.pad (negative values crop, matching F.pad).
    Rows falling outside [0, target_size) are dropped; padded rows stay all-zero.
    """
    out_size = 2 * in_size                      # nn.Upsample(scale_factor=2)
    m = np.zeros((target_size, in_size), dtype=np.float32)
    scale = (in_size - 1) / (out_size - 1) if out_size > 1 else 0.0
    for o in range(out_size):
        r = o + pad_before
        if r < 0 or r >= target_size:
            continue
        src = o * scale                         # align_corners=True source coordinate
        i0 = min(max(int(np.floor(src)), 0), in_size - 1)
        i1 = min(i0 + 1, in_size - 1)
        w1 = float(src - i0)
        m[r, i0] += 1.0 - w1
        m[r, i1] += w1
    return m


def _deepsea_up_kernel(a_h_ref, a_wt_ref, x1_ref, x2_ref, o_ref):
    """One grid step == one batch element.

    a_h_ref : (H2, H1)        row interpolation matrix (pad folded in), f32
    a_wt_ref: (W1, W2)        column interpolation matrix, pre-transposed, f32
    x1_ref  : (C1, H1, W1)    low-res features to upsample
    x2_ref  : (C2, H2, W2)    skip connection
    o_ref   : (C2+C1, H2, W2) concat([x2, up(x1)], channel axis)
    """
    c1, h1, w1 = x1_ref.shape
    c2 = x2_ref.shape[0]

    # Channel-concat part 1: skip connection occupies the leading channels (one store).
    o_ref[0:c2] = x2_ref[...].astype(o_ref.dtype)

    a_h = a_h_ref[...]                          # (H2, H1) f32
    a_wt = a_wt_ref[...]                        # (W1, W2) f32

    # Width interpolation for all channels in ONE MXU matmul:
    #   (C1*H1, W1) @ (W1, W2) -> (C1*H1, W2)
    x_flat = x1_ref[...].astype(jnp.float32).reshape(c1 * h1, w1)
    t = jnp.dot(x_flat, a_wt, preferred_element_type=jnp.float32)

    # Height interpolation per channel; C1 is a tiny static count so this fully unrolls
    # into plain 2-D MXU matmuls, each stored straight into its output channel.
    for c in range(c1):
        t_c = t[c * h1:(c + 1) * h1, :]                                 # (H1, W2)
        up_c = jnp.dot(a_h, t_c, preferred_element_type=jnp.float32)    # (H2, W2)
        o_ref[c2 + c] = up_c.astype(o_ref.dtype)


def deepsea_up(x1, x2):
    """x1: (B, C1, H1, W1) low-res; x2: (B, C2, H2, W2) skip. Returns (B, C2+C1, H2, W2)."""
    B, C1, H1, W1 = x1.shape
    B2, C2, H2, W2 = x2.shape
    assert B == B2, "batch mismatch"

    diff_y = H2 - 2 * H1
    diff_x = W2 - 2 * W1
    a_h = jnp.asarray(_axis_interp_matrix(H1, H2, diff_y // 2))         # (H2, H1)
    a_wt = jnp.asarray(_axis_interp_matrix(W1, W2, diff_x // 2).T)      # (W1, W2)

    out_dtype = jnp.result_type(x1.dtype, x2.dtype)

    return pl.pallas_call(
        _deepsea_up_kernel,
        out_shape=jax.ShapeDtypeStruct((B, C2 + C1, H2, W2), out_dtype),
        grid_spec=pltpu.PrefetchScalarGridSpec(
            num_scalar_prefetch=0,
            grid=(B,),
            in_specs=[
                pl.BlockSpec((H2, H1), lambda b: (0, 0)),                  # A_h   (VMEM-resident)
                pl.BlockSpec((W1, W2), lambda b: (0, 0)),                  # A_w^T (VMEM-resident)
                pl.BlockSpec((None, C1, H1, W1), lambda b: (b, 0, 0, 0)),  # x1[b]
                pl.BlockSpec((None, C2, H2, W2), lambda b: (b, 0, 0, 0)),  # x2[b]
            ],
            out_specs=pl.BlockSpec((None, C2 + C1, H2, W2), lambda b: (b, 0, 0, 0)),
        ),
        compiler_params=pltpu.CompilerParams(
            dimension_semantics=("parallel",),
        ),
    )(a_h, a_wt, x1, x2)


# ---------------------------------------------------------------------------
# Pure-JAX reference (independent gather-based implementation of the module).
# ---------------------------------------------------------------------------
def _bilinear_up2_align_corners_ref(x):
    B, C, H, W = x.shape
    Ho, Wo = 2 * H, 2 * W
    sy = (H - 1) / (Ho - 1) if Ho > 1 else 0.0
    sx = (W - 1) / (Wo - 1) if Wo > 1 else 0.0
    ys = jnp.arange(Ho, dtype=jnp.float32) * sy
    xs = jnp.arange(Wo, dtype=jnp.float32) * sx
    y0 = jnp.clip(jnp.floor(ys).astype(jnp.int32), 0, H - 1)
    y1 = jnp.minimum(y0 + 1, H - 1)
    x0 = jnp.clip(jnp.floor(xs).astype(jnp.int32), 0, W - 1)
    x1i = jnp.minimum(x0 + 1, W - 1)
    wy = (ys - y0.astype(jnp.float32))[None, None, :, None]
    wx = (xs - x0.astype(jnp.float32))[None, None, None, :]
    v00 = x[:, :, y0, :][:, :, :, x0]
    v01 = x[:, :, y0, :][:, :, :, x1i]
    v10 = x[:, :, y1, :][:, :, :, x0]
    v11 = x[:, :, y1, :][:, :, :, x1i]
    top = v00 * (1.0 - wx) + v01 * wx
    bot = v10 * (1.0 - wx) + v11 * wx
    return top * (1.0 - wy) + bot * wy


def deepsea_up_reference(x1, x2):
    u = _bilinear_up2_align_corners_ref(x1.astype(jnp.float32))
    diff_y = x2.shape[2] - u.shape[2]
    diff_x = x2.shape[3] - u.shape[3]
    u = jnp.pad(u, ((0, 0), (0, 0),
                    (diff_y // 2, diff_y - diff_y // 2),
                    (diff_x // 2, diff_x - diff_x // 2)))
    return jnp.concatenate([x2.astype(jnp.float32), u], axis=1)


if __name__ == "__main__":
    # Small shapes consistent with the module: x1 upsamples 8x8 -> 16x16 and is padded
    # to the (slightly larger, odd) skip-connection spatial dims, then concatenated.
    B, C1, H1, W1 = 2, 4, 8, 8
    C2, H2, W2 = 4, 17, 18

    key = jax.random.PRNGKey(0)
    k1, k2 = jax.random.split(key)
    x1 = jax.random.normal(k1, (B, C1, H1, W1), dtype=jnp.float32)
    x2 = jax.random.normal(k2, (B, C2, H2, W2), dtype=jnp.float32)

    out = deepsea_up(x1, x2)
    out = jax.block_until_ready(out)

    ref = deepsea_up_reference(x1, x2)
    assert out.shape == (B, C2 + C1, H2, W2)
    assert jnp.allclose(out, ref.astype(out.dtype), atol=1e-5, rtol=1e-5), "mismatch vs reference"

    print("KERNEL_OK")
</pallas_src>

<mosaic_0001>
module attributes {stable_mosaic.version = 11 : i64} {
  func.func @_deepsea_up_kernel(%arg0: i32, %arg1: memref<17x8xf32, #tpu.memory_space<vmem>>, %arg2: memref<8x18xf32, #tpu.memory_space<vmem>>, %arg3: memref<1x4x8x8xf32, #tpu.memory_space<vmem>>, %arg4: memref<1x4x17x18xf32, #tpu.memory_space<vmem>>, %arg5: memref<1x8x17x18xf32, #tpu.memory_space<vmem>>) attributes {dimension_semantics = [#tpu.dimension_semantics<parallel>], iteration_bounds = array<i64: 2>, scalar_prefetch = 0 : i64, scratch_operands = 0 : i64, tpu.core_type = #tpu.core_type<tc>, window_params = [{pipeline_mode = #tpu.pipeline_mode<synchronous>, transform_indices = @transform_0, window_bounds = array<i64: 17, 8>}, {pipeline_mode = #tpu.pipeline_mode<synchronous>, transform_indices = @transform_1, window_bounds = array<i64: 8, 18>}, {transform_indices = @transform_2, window_bounds = array<i64: 1, 4, 8, 8>}, {transform_indices = @transform_3, window_bounds = array<i64: 1, 4, 17, 18>}, {transform_indices = @transform_4, window_bounds = array<i64: 1, 8, 17, 18>}]} {
    %c0 = arith.constant 0 : index
    %c0_0 = arith.constant 0 : index
    %c0_1 = arith.constant 0 : index
    %c0_2 = arith.constant 0 : index
    %0 = vector.load %arg4[%c0, %c0_0, %c0_1, %c0_2] : memref<1x4x17x18xf32, #tpu.memory_space<vmem>>, vector<1x4x17x18xf32>
    %1 = vector.shape_cast %0 : vector<1x4x17x18xf32> to vector<4x17x18xf32>
    %c0_3 = arith.constant 0 : index
    %c0_4 = arith.constant 0 : index
    %c0_5 = arith.constant 0 : index
    %c0_6 = arith.constant 0 : index
    %2 = vector.load %arg5[%c0_3, %c0_4, %c0_5, %c0_6] : memref<1x8x17x18xf32, #tpu.memory_space<vmem>>, vector<1x4x17x18xf32>
    %3 = vector.shape_cast %2 : vector<1x4x17x18xf32> to vector<4x17x18xf32>
    %4 = vector.shape_cast %1 : vector<4x17x18xf32> to vector<1x4x17x18xf32>
    tpu.vector_store %arg5[%c0_3, %c0_4, %c0_5, %c0_6], %4 {strides = array<i32>} : memref<1x8x17x18xf32, #tpu.memory_space<vmem>>, vector<1x4x17x18xf32>,
    %c0_7 = arith.constant 0 : index
    %c0_8 = arith.constant 0 : index
    %5 = vector.load %arg1[%c0_7, %c0_8] : memref<17x8xf32, #tpu.memory_space<vmem>>, vector<17x8xf32>
    %c0_9 = arith.constant 0 : index
    %c0_10 = arith.constant 0 : index
    %6 = vector.load %arg2[%c0_9, %c0_10] : memref<8x18xf32, #tpu.memory_space<vmem>>, vector<8x18xf32>
    %c0_11 = arith.constant 0 : index
    %c0_12 = arith.constant 0 : index
    %c0_13 = arith.constant 0 : index
    %c0_14 = arith.constant 0 : index
    %7 = vector.load %arg3[%c0_11, %c0_12, %c0_13, %c0_14] : memref<1x4x8x8xf32, #tpu.memory_space<vmem>>, vector<1x4x8x8xf32>
    %8 = vector.shape_cast %7 : vector<1x4x8x8xf32> to vector<4x8x8xf32>
    %9 = vector.shape_cast %8 : vector<4x8x8xf32> to vector<32x8xf32>
    %cst = arith.constant dense<0.000000e+00> : vector<32x18xf32>
    %10 = tpu.matmul %9, %6, %cst {dimension_numbers = #tpu.dot_dimension_numbers<[1], [0], [0], [1], [0, 0, 1, 1], [], []>} : vector<32x8xf32>, vector<8x18xf32>, vector<32x18xf32> -> vector<32x18xf32>
    %11 = vector.extract_strided_slice %10 {offsets = [0, 0], sizes = [8, 18], strides = [1, 1]} : vector<32x18xf32> to vector<8x18xf32>
    %cst_15 = arith.constant dense<0.000000e+00> : vector<17x18xf32>
    %12 = tpu.matmul %5, %11, %cst_15 {dimension_numbers = #tpu.dot_dimension_numbers<[1], [0], [0], [1], [0, 0, 1, 1], [], []>} : vector<17x8xf32>, vector<8x18xf32>, vector<17x18xf32> -> vector<17x18xf32>
    %c0_16 = arith.constant 0 : index
    %c4 = arith.constant 4 : index
    %c0_17 = arith.constant 0 : index
    %c0_18 = arith.constant 0 : index
    %13 = vector.load %arg5[%c0_16, %c4, %c0_17, %c0_18] : memref<1x8x17x18xf32, #tpu.memory_space<vmem>>, vector<1x1x17x18xf32>
    %14 = vector.shape_cast %13 : vector<1x1x17x18xf32> to vector<17x18xf32>
    %15 = vector.shape_cast %12 : vector<17x18xf32> to vector<1x1x17x18xf32>
    tpu.vector_store %arg5[%c0_16, %c4, %c0_17, %c0_18], %15 {strides = array<i32>} : memref<1x8x17x18xf32, #tpu.memory_space<vmem>>, vector<1x1x17x18xf32>,
    %16 = vector.extract_strided_slice %10 {offsets = [8, 0], sizes = [8, 18], strides = [1, 1]} : vector<32x18xf32> to vector<8x18xf32>
    %cst_19 = arith.constant dense<0.000000e+00> : vector<17x18xf32>
    %17 = tpu.matmul %5, %16, %cst_19 {dimension_numbers = #tpu.dot_dimension_numbers<[1], [0], [0], [1], [0, 0, 1, 1], [], []>} : vector<17x8xf32>, vector<8x18xf32>, vector<17x18xf32> -> vector<17x18xf32>
    %c0_20 = arith.constant 0 : index
    %c5 = arith.constant 5 : index
    %c0_21 = arith.constant 0 : index
    %c0_22 = arith.constant 0 : index
    %18 = vector.load %arg5[%c0_20, %c5, %c0_21, %c0_22] : memref<1x8x17x18xf32, #tpu.memory_space<vmem>>, vector<1x1x17x18xf32>
    %19 = vector.shape_cast %18 : vector<1x1x17x18xf32> to vector<17x18xf32>
    %20 = vector.shape_cast %17 : vector<17x18xf32> to vector<1x1x17x18xf32>
    tpu.vector_store %arg5[%c0_20, %c5, %c0_21, %c0_22], %20 {strides = array<i32>} : memref<1x8x17x18xf32, #tpu.memory_space<vmem>>, vector<1x1x17x18xf32>,
    %21 = vector.extract_strided_slice %10 {offsets = [16, 0], sizes = [8, 18], strides = [1, 1]} : vector<32x18xf32> to vector<8x18xf32>
    %cst_23 = arith.constant dense<0.000000e+00> : vector<17x18xf32>
    %22 = tpu.matmul %5, %21, %cst_23 {dimension_numbers = #tpu.dot_dimension_numbers<[1], [0], [0], [1], [0, 0, 1, 1], [], []>} : vector<17x8xf32>, vector<8x18xf32>, vector<17x18xf32> -> vector<17x18xf32>
    %c0_24 = arith.constant 0 : index
    %c6 = arith.constant 6 : index
    %c0_25 = arith.constant 0 : index
    %c0_26 = arith.constant 0 : index
    %23 = vector.load %arg5[%c0_24, %c6, %c0_25, %c0_26] : memref<1x8x17x18xf32, #tpu.memory_space<vmem>>, vector<1x1x17x18xf32>
    %24 = vector.shape_cast %23 : vector<1x1x17x18xf32> to vector<17x18xf32>
    %25 = vector.shape_cast %22 : vector<17x18xf32> to vector<1x1x17x18xf32>
    tpu.vector_store %arg5[%c0_24, %c6, %c0_25, %c0_26], %25 {strides = array<i32>} : memref<1x8x17x18xf32, #tpu.memory_space<vmem>>, vector<1x1x17x18xf32>,
    %26 = vector.extract_strided_slice %10 {offsets = [24, 0], sizes = [8, 18], strides = [1, 1]} : vector<32x18xf32> to vector<8x18xf32>
    %cst_27 = arith.constant dense<0.000000e+00> : vector<17x18xf32>
    %27 = tpu.matmul %5, %26, %cst_27 {dimension_numbers = #tpu.dot_dimension_numbers<[1], [0], [0], [1], [0, 0, 1, 1], [], []>} : vector<17x8xf32>, vector<8x18xf32>, vector<17x18xf32> -> vector<17x18xf32>
    %c0_28 = arith.constant 0 : index
    %c7 = arith.constant 7 : index
    %c0_29 = arith.constant 0 : index
    %c0_30 = arith.constant 0 : index
    %28 = vector.load %arg5[%c0_28, %c7, %c0_29, %c0_30] : memref<1x8x17x18xf32, #tpu.memory_space<vmem>>, vector<1x1x17x18xf32>
    %29 = vector.shape_cast %28 : vector<1x1x17x18xf32> to vector<17x18xf32>
    %30 = vector.shape_cast %27 : vector<17x18xf32> to vector<1x1x17x18xf32>
    tpu.vector_store %arg5[%c0_28, %c7, %c0_29, %c0_30], %30 {strides = array<i32>} : memref<1x8x17x18xf32, #tpu.memory_space<vmem>>, vector<1x1x17x18xf32>,
    return
  }
  func.func @transform_0(%arg0: i32) -> (i32, i32) {
    %c0_i32 = arith.constant 0 : i32
    %c0_i32_0 = arith.constant 0 : i32
    %c0_i32_1 = arith.constant 0 : i32
    return %c0_i32, %c0_i32_0 : i32, i32
  }
  func.func @transform_1(%arg0: i32) -> (i32, i32) {
    %c0_i32 = arith.constant 0 : i32
    %c0_i32_0 = arith.constant 0 : i32
    %c0_i32_1 = arith.constant 0 : i32
    return %c0_i32, %c0_i32_0 : i32, i32
  }
  func.func @transform_2(%arg0: i32) -> (i32, i32, i32, i32) {
    %c0_i32 = arith.constant 0 : i32
    %c0_i32_0 = arith.constant 0 : i32
    %c0_i32_1 = arith.constant 0 : i32
    %c0_i32_2 = arith.constant 0 : i32
    return %arg0, %c0_i32, %c0_i32_0, %c0_i32_1 : i32, i32, i32, i32
  }
  func.func @transform_3(%arg0: i32) -> (i32, i32, i32, i32) {
    %c0_i32 = arith.constant 0 : i32
    %c0_i32_0 = arith.constant 0 : i32
    %c0_i32_1 = arith.constant 0 : i32
    %c0_i32_2 = arith.constant 0 : i32
    return %arg0, %c0_i32, %c0_i32_0, %c0_i32_1 : i32, i32, i32, i32
  }
  func.func @transform_4(%arg0: i32) -> (i32, i32, i32, i32) {
    %c0_i32 = arith.constant 0 : i32
    %c0_i32_0 = arith.constant 0 : i32
    %c0_i32_1 = arith.constant 0 : i32
    %c0_i32_2 = arith.constant 0 : i32
    return %arg0, %c0_i32, %c0_i32_0, %c0_i32_1 : i32, i32, i32, i32
  }
}

</mosaic_0001>

<bundles_post_ra>
// kernel: tpu_custom_call.1
= control target key start
LH: loop header
LB: loop body
LE: loop exit
PB: predicated region body
PF: predicated region fallthrough
CT: control target
= control target key end

     0   :  { %s924_s15 = smov 0   ;;  %s1048_s0 = inlined_call_operand.vmem [shape: f32[17,8], index: 0, kind: input, shape index: {}]   ;;  %s1049_s1 = inlined_call_operand.vmem [shape: f32[8,18], index: 1, kind: input, shape index: {}]   ;;  %s1050_s2 = inlined_call_operand.vmem [shape: f32[2,4,8,8], index: 2, kind: input, shape index: {}]   ;;  %s1051_s3 = inlined_call_operand.vmem [shape: f32[2,4,17,18], index: 3, kind: input, shape index: {}]   ;;  %s1052_s4 = inlined_call_operand.vmem [shape: f32[2,8,17,18], index: 4, kind: output, shape index: {}]  }
   0x1 LB: > { %s762_s16 = sadd.s32 4294967295, %s895_s15   ;;  %p766_p0 = scmp.ge.s32.totalorder %s895_s15, 1  ;;  %s895_s15 = sphi %s924_s15, %s14_s15  }
   0x2   : > { %p172_p1 = scmp.lt.s32.totalorder %s895_s15, 3 }
   0x4   : > { %p173_p2 = pnand %p766_p0, %p172_p1 }
   0x5   : > { %p203_p3 = scmp.lt.s32.totalorder (!%p173_p2), %s762_s16, 1 }
   0x6   : > { %176 = sbr.rel (%p173_p2) target bundleno = 428 (0x1ac), region = 36 }
   0xb   : > { %v247_v0 = vld [vmem:[%s1049_s1] sm:$0xff]  ;;  %s1054_s16 = smov (!%p203_p3, %s762_s16), 1  ;;  %vm252_vm0 = vcmask 64512   ;;  %vm230_vm1 = vcmask 146432   ;;  %v897_v13 = vmov 0.0   ;;  %vm898_vm2 = vmmov 0  }
   0xc   : > { %823 = vmatprep.subr.mxu0 %v247_v0  ;;  %875 = vmatprep.subr.mxu1 %v247_v0  ;;  %s801_s19 = sshll.u32 %s1054_s16, 5  ;;  %s877_s20 = smul.u32 96, %s1054_s16  ;;  %v244_v14 = vld [vmem:[%s1048_s0] sm:$0xff]  ;;  %v245_v19 = vld [vmem:[%s1048_s0 + $0x8] sm:$0xff]  ;;  %v246_v20 = vld [vmem:[%s1048_s0 + $0x10] sm:$0x1] }
   0xd   : > { %824 = vmatpush3.msra.mxu0 %v247_v0  ;;  %876 = vmatpush3.msra.mxu1 %v247_v0  ;;  %s207_s23 = scalar_lea.vmem %s1050_s2, %s801_s19  ;;  %s878_s24 = smul.u32 192, %s1054_s16  ;;  %vm233_vm3 = vcmask 139264  }
   0xe   : > { %s941_s27 = scalar_lea.vmem %s1051_s3, %s877_s20  ;;  %v248_v1 = vld [vmem:[%s207_s23] sm:$0xff]  ;;  %v249_v2 = vld [vmem:[%s207_s23 + $0x8] sm:$0xff]  ;;  %v250_v3 = vld [vmem:[%s207_s23 + $0x10] sm:$0xff]  ;;  %842 = vmatprep.subr.mxu0 %v897_v13  ;;  %831 = vmatprep.subr.mxu1 %v897_v13 }
   0xf   : > { %s946_s30 = scalar_lea.vmem %s1052_s4, %s878_s24  ;;  %v218_v4 = vld [vmem:[%s941_s27] sm:$0xff]  ;;  %v219_v5 = vld [vmem:[%s941_s27 + $0x8] sm:$0xff]  ;;  %v221_v6 = vld [vmem:[%s941_s27 + $0x18] sm:$0xff]  ;;  %825 = vmatprep.mubr.msk.f32.mxu0 %vm252_vm0, %v248_v1  ;;  %828 = vmatprep.mubr.msk.f32.mxu1 %vm252_vm0, %v250_v3 }
  0x10   : > { %v222_v7 = vld [vmem:[%s941_s27 + $0x20] sm:$0xff]  ;;  %v224_v8 = vld [vmem:[%s941_s27 + $0x30] sm:$0xff]  ;;  %v225_v9 = vld [vmem:[%s941_s27 + $0x38] sm:$0xff]  ;;  %231 = vst.msk [vmem:[%s946_s30] sm:$0xff] %vm230_vm1, %v218_v4  ;;  %826 = vmatmul.mubr.msk.f32.vlgmr.msra.gmra.mxu0 %vm252_vm0, %v249_v2 }
  0x11   : > { %232 = vst.msk [vmem:[%s946_s30 + $0x8] sm:$0xff] %vm230_vm1, %v219_v5  ;;  %235 = vst.msk [vmem:[%s946_s30 + $0x18] sm:$0xff] %vm230_vm1, %v221_v6  ;;  %v227_v10 = vld [vmem:[%s941_s27 + $0x48] sm:$0xff]  ;;  %v228_v11 = vld [vmem:[%s941_s27 + $0x50] sm:$0xff]  ;;  %844 = vmatprep.mubr.msk.f32.mxu0 %vm898_vm2, %v897_v13 }
  0x12   : > { %236 = vst.msk [vmem:[%s946_s30 + $0x20] sm:$0xff] %vm230_vm1, %v222_v7  ;;  %238 = vst.msk [vmem:[%s946_s30 + $0x30] sm:$0xff] %vm230_vm1, %v224_v8  ;;  %v251_v12 = vld [vmem:[%s207_s23 + $0x18] sm:$0xff]  ;;  %v220_v21 = vld [vmem:[%s941_s27 + $0x10] sm:$0x1] }
  0x13   : > { %239 = vst.msk [vmem:[%s946_s30 + $0x38] sm:$0xff] %vm230_vm1, %v225_v9  ;;  %241 = vst.msk [vmem:[%s946_s30 + $0x48] sm:$0xff] %vm230_vm1, %v227_v10  ;;  %829 = vmatmul.mubr.msk.f32.vlgmr.msra.gmra.mxu1 %vm252_vm0, %v251_v12  ;;  %v223_v22 = vld [vmem:[%s941_s27 + $0x28] sm:$0x1]  ;;  %v226_v23 = vld [vmem:[%s941_s27 + $0x40] sm:$0x1] }
  0x14   : > { %242 = vst.msk [vmem:[%s946_s30 + $0x50] sm:$0xff] %vm230_vm1, %v228_v11  ;;  %833 = vmatprep.mubr.msk.f32.mxu1 %vm898_vm2, %v897_v13  ;;  %v229_v24 = vld [vmem:[%s941_s27 + $0x58] sm:$0x1] }
  0x15   : > { %234 = vst.msk [vmem:[%s946_s30 + $0x10] sm:$0x1] %vm233_vm3, %v220_v21  ;;  %237 = vst.msk [vmem:[%s946_s30 + $0x28] sm:$0x1] %vm233_vm3, %v223_v22 }
  0x16   : > { %240 = vst.msk [vmem:[%s946_s30 + $0x40] sm:$0x1] %vm233_vm3, %v226_v23  ;;  %243 = vst.msk [vmem:[%s946_s30 + $0x58] sm:$0x1] %vm233_vm3, %v229_v24 }
  0xd0   : > { %v827_v15 = vpop.f32.mrf.mxu0 }
  0xd1   : > { %843 = vmatpush3.msra.mxu0 %v827_v15 }
  0xd2   : > { %v331_v16 = vpop.f32.mrf.mxu0  ;;  %864 = vmatprep.subr.mxu0 %v897_v13  ;;  %845 = vmatmul.mubr.msk.f32.vlgmr.msra.gmra.mxu0 %vm252_vm0, %v244_v14 }
  0xd3   : > { %v830_v17 = vpop.f32.mrf.mxu1  ;;  %832 = vmatpush3.msra.mxu1 %v331_v16  ;;  %847 = vmatprep.mubr.msk.f32.mxu0 %vm898_vm2, %v897_v13 }
  0xd4   : > { %865 = vmatpush3.msra.mxu0 %v830_v17  ;;  %853 = vmatprep.subr.mxu1 %v897_v13 }
  0xd5   : > { %v341_v18 = vpop.f32.mrf.mxu1  ;;  %834 = vmatmul.mubr.msk.f32.vlgmr.msra.gmra.mxu1 %vm252_vm0, %v244_v14 }
  0xd6   : > { %854 = vmatpush3.msra.mxu1 %v341_v18  ;;  %836 = vmatprep.mubr.msk.f32.mxu1 %vm898_vm2, %v897_v13 }
  0xd7   : > { %848 = vmatmul.mubr.msk.f32.gmra.mxu0 %vm252_vm0, %v245_v19 }
  0xd8   : > { %850 = vmatprep.mubr.msk.f32.mxu0 %vm898_vm2, %v897_v13 }
  0xd9   : > { %837 = vmatmul.mubr.msk.f32.gmra.mxu1 %vm252_vm0, %v245_v19 }
  0xda   : > { %839 = vmatprep.mubr.msk.f32.mxu1 %vm898_vm2, %v897_v13 }
  0xdb   : > { %851 = vmatmul.mubr.msk.f32.gmra.mxu0 %vm252_vm0, %v246_v20 }
  0xdc   : > { %866 = vmatprep.mubr.msk.f32.mxu0 %vm898_vm2, %v897_v13 }
  0xdd   : > { %840 = vmatmul.mubr.msk.f32.gmra.mxu1 %vm252_vm0, %v246_v20 }
  0xde   : > { %855 = vmatprep.mubr.msk.f32.mxu1 %vm898_vm2, %v897_v13 }
  0xdf   : > { %867 = vmatmul.mubr.msk.f32.vlgmr.msra.gmra.mxu0 %vm252_vm0, %v244_v14 }
  0xe0   : > { %869 = vmatprep.mubr.msk.f32.mxu0 %vm898_vm2, %v897_v13 }
  0xe1   : > { %856 = vmatmul.mubr.msk.f32.vlgmr.msra.gmra.mxu1 %vm252_vm0, %v244_v14 }
  0xe2   : > { %858 = vmatprep.mubr.msk.f32.mxu1 %vm898_vm2, %v897_v13 }
  0xe3   : > { %870 = vmatmul.mubr.msk.f32.gmra.mxu0 %vm252_vm0, %v245_v19 }
  0xe4   : > { %872 = vmatprep.mubr.msk.f32.mxu0 %vm898_vm2, %v897_v13 }
  0xe5   : > { %859 = vmatmul.mubr.msk.f32.gmra.mxu1 %vm252_vm0, %v245_v19 }
  0xe6   : > { %861 = vmatprep.mubr.msk.f32.mxu1 %vm898_vm2, %v897_v13 }
  0xe7   : > { %873 = vmatmul.mubr.msk.f32.gmra.mxu0 %vm252_vm0, %v246_v20 }
  0xe9   : > { %862 = vmatmul.mubr.msk.f32.gmra.mxu1 %vm252_vm0, %v246_v20 }
 0x192   : > { %v509_v25 = vpop.f32.mrf.mxu0 }
 0x193   : > { %784 = vst.msk [vmem:[%s946_s30 + $0x78] sm:$0xff] %vm230_vm1, %v509_v25 }
 0x194   : > { %v846_v27 = vpop.f32.mrf.mxu0 }
 0x195   : > { %v425_v26 = vpop.f32.mrf.mxu1 }
 0x196   : > { %778 = vst.msk [vmem:[%s946_s30 + $0x60] sm:$0xff] %vm230_vm1, %v425_v26 }
 0x197   : > { %v835_v28 = vpop.f32.mrf.mxu1  ;;  %v514_v29 = vpop.f32.mrf.mxu0 }
 0x198   : > { %785 = vst.msk [vmem:[%s946_s30 + $0x80] sm:$0xff] %vm230_vm1, %v514_v29 }
 0x199   : > { %v430_v30 = vpop.f32.mrf.mxu1  ;;  %v849_v31 = vpop.f32.mrf.mxu0 }
 0x19a   : > { %779 = vst.msk [vmem:[%s946_s30 + $0x68] sm:$0xff] %vm230_vm1, %v430_v30 }
 0x19b   : > { %v838_v32 = vpop.f32.mrf.mxu1  ;;  %v519_v33 = vpop.f32.mrf.mxu0 }
 0x19c   : > { %786 = vst.msk [vmem:[%s946_s30 + $0x88] sm:$0x1] %vm233_vm3, %v519_v33 }
 0x19d   : > { %v435_v34 = vpop.f32.mrf.mxu1  ;;  %v852_v35 = vpop.f32.mrf.mxu0 }
 0x19e   : > { %780 = vst.msk [vmem:[%s946_s30 + $0x70] sm:$0x1] %vm233_vm3, %v435_v34 }
 0x19f   : > { %v841_v36 = vpop.f32.mrf.mxu1  ;;  %v677_v37 = vpop.f32.mrf.mxu0 }
 0x1a0   : > { %796 = vst.msk [vmem:[%s946_s30 + $0xa8] sm:$0xff] %vm230_vm1, %v677_v37 }
 0x1a1   : > { %v593_v38 = vpop.f32.mrf.mxu1  ;;  %v868_v39 = vpop.f32.mrf.mxu0 }
 0x1a2   : > { %790 = vst.msk [vmem:[%s946_s30 + $0x90] sm:$0xff] %vm230_vm1, %v593_v38 }
 0x1a3   : > { %v857_v40 = vpop.f32.mrf.mxu1  ;;  %v682_v41 = vpop.f32.mrf.mxu0 }
 0x1a4   : > { %797 = vst.msk [vmem:[%s946_s30 + $0xb0] sm:$0xff] %vm230_vm1, %v682_v41 }
 0x1a5   : > { %v598_v42 = vpop.f32.mrf.mxu1  ;;  %v871_v43 = vpop.f32.mrf.mxu0 }
 0x1a6   : > { %791 = vst.msk [vmem:[%s946_s30 + $0x98] sm:$0xff] %vm230_vm1, %v598_v42 }
 0x1a7   : > { %v860_v44 = vpop.f32.mrf.mxu1  ;;  %v687_v45 = vpop.f32.mrf.mxu0 }
 0x1a8   : > { %798 = vst.msk [vmem:[%s946_s30 + $0xb8] sm:$0x1] %vm233_vm3, %v687_v45 }
 0x1a9   : > { %v603_v46 = vpop.f32.mrf.mxu1  ;;  %v874_v47 = vpop.f32.mrf.mxu0 }
 0x1aa   : > { %792 = vst.msk [vmem:[%s946_s30 + $0xa0] sm:$0x1] %vm233_vm3, %v603_v46 }
 0x1ab   : > { %v863_v48 = vpop.f32.mrf.mxu1 }
 0x1ac PF: > { %s14_s15 = sadd.s32 1, %s895_s15  }
 0x1ad   : > { %p11_p4 = scmp.ge.s32.totalorder %s14_s15, 4  }
 0x1af   :  { %13 = sbr.rel (!%p11_p4) target bundleno = 1 (0x1), region = 73 }

</bundles_post_ra>
